<compile_context>
chip_gen: v7x
topology: tpu7x:2x2x1
jax: 0.10.0
libtpu: 0.0.40
codegen_flags: <defaults>
</compile_context>

<pallas_src>
import functools

import jax
import jax.numpy as jnp
from jax.experimental import pallas as pl
from jax.experimental.pallas import tpu as pltpu


def _half_dropout_kernel(seed_ref, x_ref, o_ref, *, ch, ch_span, hw,
                         ch_tile, hw_tile, threshold, keep_scale, mask_rows):
    # x_ref / o_ref : (1, ch_tile, hw_tile) block.
    b = pl.program_id(0)
    cb = pl.program_id(1)
    hb = pl.program_id(2)

    x = x_ref[0]                                            # (ch_tile, hw_tile)

    # Global coordinates of every element (channel within the batch element,
    # flattened spatial position) -> a unique 32-bit counter per element.
    row = jax.lax.broadcasted_iota(jnp.int32, x.shape, 0)
    col = jax.lax.broadcasted_iota(jnp.int32, x.shape, 1)
    chan = row + cb * ch_tile
    idx = ((b * ch_span + chan) * hw + hb * hw_tile + col).astype(jnp.uint32)

    # splitmix32-style finalizer ("lowbias32"); portable integer VPU ops only.
    h = idx ^ (seed_ref[0].astype(jnp.uint32) * jnp.uint32(0x9E3779B9))
    h = h ^ (h >> 16)
    h = h * jnp.uint32(0x7FEB352D)
    h = h ^ (h >> 15)
    h = h * jnp.uint32(0x846CA68B)
    h = h ^ (h >> 16)

    keep = h >= jnp.uint32(threshold)            # P(drop) = threshold / 2**32 ~= p
    dropped = jnp.where(keep, x * keep_scale, 0.0)          # inverted dropout

    if mask_rows:
        # Block also covers passthrough channels: only channels < ch get dropout.
        out = jnp.where(chan < ch, dropped, x)
    else:
        out = dropped
    o_ref[0] = out.astype(o_ref.dtype)


def _pick_tile(n, unit, cap):
    """Largest divisor of n that is a multiple of `unit` and <= cap.
    Returns n itself if n <= cap (block dim == full array dim is always legal),
    and falls back to n if no aligned divisor exists."""
    if n <= cap:
        return n
    t = (cap // unit) * unit
    while t >= unit:
        if n % t == 0:
            return t
        t -= unit
    return n


def half_dropout(x, seed, p=0.3, training=True):
    """HalfDropout forward. x: (B, C, H, W) NCHW (same layout as torch)."""
    B, C, H, W = x.shape
    ch = C // 2
    p = float(p)
    if (not training) or p <= 0.0 or ch == 0:
        return x                               # eval / no-op: zero HBM traffic

    hw = H * W
    xf = x.reshape(B, C, hw)                   # contiguous reshape: lane-dense last dim

    # --- Tiling --------------------------------------------------------------
    # If the dropout half tiles into multiple-of-8 channel blocks, cover ONLY
    # channels [0, ch) (the aliased output keeps the rest untouched).  For
    # tiny/odd channel counts, cover the full channel dim (block dim == array
    # dim keeps the layout legal) and row-mask the passthrough half in-kernel.
    MAX_BLOCK_ELEMS = 512 * 512                # ~1 MiB f32 per block; double-buffered
                                               # in+out stays well inside v7x's VMEM
    if ch % 8 == 0:
        ch_span, mask_rows = ch, False
    else:
        ch_span, mask_rows = C, True

    hw_tile = _pick_tile(hw, 128, min(hw, MAX_BLOCK_ELEMS))
    if mask_rows:
        ch_tile = ch_span
    else:
        ch_tile = _pick_tile(ch_span, 8, max(8, MAX_BLOCK_ELEMS // hw_tile))
    grid = (B, ch_span // ch_tile, hw // hw_tile)

    threshold = min(int(round(p * 2.0 ** 32)), 2 ** 32 - 1)
    keep_scale = 0.0 if p >= 1.0 else 1.0 / (1.0 - p)      # p>=1: zero everything
    seed_arr = jnp.asarray(seed, dtype=jnp.int32).reshape((1,))

    kernel = functools.partial(
        _half_dropout_kernel, ch=ch, ch_span=ch_span, hw=hw,
        ch_tile=ch_tile, hw_tile=hw_tile,
        threshold=threshold, keep_scale=keep_scale, mask_rows=mask_rows)

    out = pl.pallas_call(
        kernel,
        out_shape=jax.ShapeDtypeStruct((B, C, hw), x.dtype),
        grid_spec=pltpu.PrefetchScalarGridSpec(
            num_scalar_prefetch=1,             # seed lands in SMEM
            grid=grid,
            in_specs=[pl.BlockSpec((1, ch_tile, hw_tile),
                                   lambda b, c, h, seed: (b, c, h))],
            out_specs=pl.BlockSpec((1, ch_tile, hw_tile),
                                   lambda b, c, h, seed: (b, c, h)),
        ),
        # xf is operand 1 (scalar-prefetch seed is operand 0); aliasing it to the
        # output means channels never tiled by the grid keep their input values
        # without crossing HBM through the kernel.
        input_output_aliases={1: 0},
        compiler_params=pltpu.CompilerParams(
            dimension_semantics=("parallel", "parallel", "parallel"),
        ),
    )(seed_arr, xf)
    return out.reshape(B, C, H, W)


if __name__ == "__main__":
    key = jax.random.PRNGKey(0)
    B, C, H, W = 2, 4, 16, 16
    p = 0.3
    x = jax.random.normal(key, (B, C, H, W), jnp.float32)

    fwd_train = jax.jit(lambda xx, s: half_dropout(xx, s, p=p, training=True))
    fwd_eval = jax.jit(lambda xx, s: half_dropout(xx, s, p=p, training=False))

    out = jax.block_until_ready(fwd_train(x, jnp.int32(42)))
    assert out.shape == (B, C, H, W), out.shape
    assert bool(jnp.all(jnp.isfinite(out)))

    ch = C // 2
    # Second half of channels must pass through untouched.
    assert bool(jnp.array_equal(out[:, ch:], x[:, ch:]))

    # First half: every element is either 0 (dropped) or x / (1 - p) (kept).
    a_in, a_out = x[:, :ch], out[:, :ch]
    kept = a_out != 0.0
    assert bool(jnp.allclose(jnp.where(kept, a_out, 0.0),
                             jnp.where(kept, a_in / (1.0 - p), 0.0),
                             rtol=1e-5, atol=1e-6))
    drop_frac = 1.0 - float(jnp.mean(kept.astype(jnp.float32)))
    assert 0.12 < drop_frac < 0.48, drop_frac   # ~p=0.3 over 1024 samples

    # Eval mode (nn.Dropout eval) is the identity — short-circuited, no kernel.
    out_eval = jax.block_until_ready(fwd_eval(x, jnp.int32(0)))
    assert bool(jnp.array_equal(out_eval, x))

    # p = 1.0 zeroes the dropout half (no divide-by-zero at trace time).
    out_p1 = jax.block_until_ready(
        jax.jit(lambda xx, s: half_dropout(xx, s, p=1.0, training=True))(x, jnp.int32(7)))
    assert bool(jnp.all(out_p1[:, :ch] == 0.0))
    assert bool(jnp.array_equal(out_p1[:, ch:], x[:, ch:]))

    print("KERNEL_OK")
</pallas_src>

<mosaic_0001>
module attributes {stable_mosaic.version = 11 : i64} {
  func.func @_half_dropout_kernel(%arg0: i32, %arg1: i32, %arg2: i32, %arg3: memref<1xi32, #tpu.memory_space<smem>>, %arg4: memref<1x4x256xf32, #tpu.memory_space<vmem>>, %arg5: memref<1x4x256xf32, #tpu.memory_space<vmem>>) attributes {dimension_semantics = [#tpu.dimension_semantics<parallel>, #tpu.dimension_semantics<parallel>, #tpu.dimension_semantics<parallel>], iteration_bounds = array<i64: 2, 1, 1>, scalar_prefetch = 1 : i64, scratch_operands = 0 : i64, tpu.core_type = #tpu.core_type<tc>, window_params = [{transform_indices = @transform_0, window_bounds = array<i64: 1, 4, 256>}, {transform_indices = @transform_1, window_bounds = array<i64: 1, 4, 256>}]} {
    %c0 = arith.constant 0 : index
    %c0_0 = arith.constant 0 : index
    %c0_1 = arith.constant 0 : index
    %0 = vector.load %arg4[%c0, %c0_0, %c0_1] : memref<1x4x256xf32, #tpu.memory_space<vmem>>, vector<1x4x256xf32>
    %1 = vector.shape_cast %0 : vector<1x4x256xf32> to vector<4x256xf32>
    %2 = tpu.iota {dimensions = array<i32: 0>} : vector<4x256xi32>
    %3 = tpu.iota {dimensions = array<i32: 1>} : vector<4x256xi32>
    %c4_i32 = arith.constant 4 : i32
    %4 = arith.muli %arg1, %c4_i32 : i32
    %5 = vector.broadcast %4 : i32 to vector<4x256xi32>
    %6 = arith.addi %2, %5 : vector<4x256xi32>
    %c4_i32_2 = arith.constant 4 : i32
    %7 = arith.muli %arg0, %c4_i32_2 : i32
    %8 = vector.broadcast %7 : i32 to vector<4x256xi32>
    %9 = arith.addi %8, %6 : vector<4x256xi32>
    %c256_i32 = arith.constant 256 : i32
    %10 = vector.broadcast %c256_i32 : i32 to vector<4x256xi32>
    %11 = arith.muli %9, %10 : vector<4x256xi32>
    %c256_i32_3 = arith.constant 256 : i32
    %12 = arith.muli %arg2, %c256_i32_3 : i32
    %13 = vector.broadcast %12 : i32 to vector<4x256xi32>
    %14 = arith.addi %11, %13 : vector<4x256xi32>
    %15 = arith.addi %14, %3 : vector<4x256xi32>
    %c0_4 = arith.constant 0 : index
    %16 = memref.load %arg3[%c0_4] : memref<1xi32, #tpu.memory_space<smem>>
    %c-1640531527_i32 = arith.constant -1640531527 : i32
    %17 = arith.muli %16, %c-1640531527_i32 : i32
    %18 = vector.broadcast %17 : i32 to vector<4x256xi32>
    %19 = arith.xori %15, %18 : vector<4x256xi32>
    %c16_i32 = arith.constant 16 : i32
    %20 = vector.broadcast %c16_i32 : i32 to vector<4x256xi32>
    %21 = arith.shrui %19, %20 : vector<4x256xi32>
    %22 = arith.xori %19, %21 : vector<4x256xi32>
    %c2146121005_i32 = arith.constant 2146121005 : i32
    %23 = vector.broadcast %c2146121005_i32 : i32 to vector<4x256xi32>
    %24 = arith.muli %22, %23 : vector<4x256xi32>
    %c15_i32 = arith.constant 15 : i32
    %25 = vector.broadcast %c15_i32 : i32 to vector<4x256xi32>
    %26 = arith.shrui %24, %25 : vector<4x256xi32>
    %27 = arith.xori %24, %26 : vector<4x256xi32>
    %c-2073254261_i32 = arith.constant -2073254261 : i32
    %28 = vector.broadcast %c-2073254261_i32 : i32 to vector<4x256xi32>
    %29 = arith.muli %27, %28 : vector<4x256xi32>
    %c16_i32_5 = arith.constant 16 : i32
    %30 = vector.broadcast %c16_i32_5 : i32 to vector<4x256xi32>
    %31 = arith.shrui %29, %30 : vector<4x256xi32>
    %32 = arith.xori %29, %31 : vector<4x256xi32>
    %c1288490189_i32 = arith.constant 1288490189 : i32
    %33 = vector.broadcast %c1288490189_i32 : i32 to vector<4x256xi32>
    %34 = arith.cmpi uge, %32, %33 : vector<4x256xi32>
    %cst = arith.constant 1.42857146 : f32
    %35 = vector.broadcast %cst : f32 to vector<4x256xf32>
    %36 = arith.mulf %1, %35 : vector<4x256xf32>
    %cst_6 = arith.constant 0.000000e+00 : f32
    %37 = vector.broadcast %cst_6 : f32 to vector<4x256xf32>
    %38 = arith.select %34, %36, %37 : vector<4x256xi1>, vector<4x256xf32>
    %c2_i32 = arith.constant 2 : i32
    %39 = vector.broadcast %c2_i32 : i32 to vector<4x256xi32>
    %40 = arith.cmpi slt, %6, %39 : vector<4x256xi32>
    %41 = arith.select %40, %38, %1 : vector<4x256xi1>, vector<4x256xf32>
    %c0_7 = arith.constant 0 : index
    %c0_8 = arith.constant 0 : index
    %c0_9 = arith.constant 0 : index
    %42 = vector.load %arg5[%c0_7, %c0_8, %c0_9] : memref<1x4x256xf32, #tpu.memory_space<vmem>>, vector<1x4x256xf32>
    %43 = vector.shape_cast %42 : vector<1x4x256xf32> to vector<4x256xf32>
    %44 = vector.shape_cast %41 : vector<4x256xf32> to vector<1x4x256xf32>
    tpu.vector_store %arg5[%c0_7, %c0_8, %c0_9], %44 {strides = array<i32>} : memref<1x4x256xf32, #tpu.memory_space<vmem>>, vector<1x4x256xf32>,
    return
  }
  func.func @transform_0(%arg0: i32, %arg1: i32, %arg2: i32, %arg3: memref<1xi32, #tpu.memory_space<smem>>) -> (i32, i32, i32) {
    %c0_i32 = arith.constant 0 : i32
    return %arg0, %arg1, %arg2 : i32, i32, i32
  }
  func.func @transform_1(%arg0: i32, %arg1: i32, %arg2: i32, %arg3: memref<1xi32, #tpu.memory_space<smem>>) -> (i32, i32, i32) {
    %c0_i32 = arith.constant 0 : i32
    return %arg0, %arg1, %arg2 : i32, i32, i32
  }
}

</mosaic_0001>

<bundles_post_ra>
// kernel: _lambda_.1
= control target key start
LH: loop header
LB: loop body
LE: loop exit
PB: predicated region body
PF: predicated region fallthrough
CT: control target
= control target key end

     0   :  { %s440_s11 = smov 0   ;;  %s442_s12 = smov 0   ;;  %s476_s0 = inlined_call_operand.<no memory space> [shape: s32[1], index: 0, kind: input, shape index: {}]   ;;  %s477_s1 = inlined_call_operand.vmem [shape: f32[2,4,256], index: 1, kind: input, shape index: {}, may-alias: {1,2}]   ;;  %s478_s2 = inlined_call_operand.vmem [shape: f32[2,4,256], index: 2, kind: output, shape index: {}, may-alias: {1,2}]  }
   0x1   :  { %7 = sst [smem:[#allocation3]] %s476_s0  ;;  %s444_s13 = smov 0  }
   0x2 LB: > { %s32_s0 = sadd.s32 1, %s416_s12  ;;  %p363_p0 = scmp.ge.s32.totalorder %s420_s13, 1  ;;  %s420_s13 = sphi %s444_s13, %s13_s13   ;;  %s416_s12 = sphi %s442_s12, %s480_s12   ;;  %s412_s11 = sphi %s440_s11, %s479_s11  }
   0x3   : > { %p34_p1 = scmp.ge.s32.totalorder %s32_s0, 2  ;;  %p125_p2 = scmp.lt.s32.totalorder %s420_s13, 3 }
   0x5   : > { %s482_s0 = smov (%p34_p1, %s32_s0), 0  ;;  %p126_p3 = pnand %p363_p0, %p125_p2 }
   0x6   : > { %v190_v0 = vlaneseq (!%p126_p3)  ;;  %s368_s14 = sshll.u32 (!%p126_p3), %s412_s11, 2  ;;  %s207_s15 = sld [smem:[#allocation3]] (!%p126_p3) }
   0x7   : > { %129 = sbr.rel (%p126_p3) target bundleno = 40 (0x28), region = 24  ;;  %v199_v1 = vstv (!%p126_p3), %s368_s14  ;;  %p162_p4 = scmp.lt.s32.totalorder (!%p126_p3), %s412_s11, 1 }
   0x8   : > { %v191_v2 = vshrl.u32 (!%p126_p3), %v190_v0, 7  ;;  %v193_v3 = vand.u32 (!%p126_p3), 127, %v190_v0 }
   0xa   : > { %v194_v4 = vadd.s32 (!%p126_p3), 128, %v193_v3  ;;  %v200_v5 = vadd.s32 (!%p126_p3), %v199_v1, %v191_v2  ;;  %vm236_vm0 = vcmp.lt.s32.totalorder (!%p126_p3), %v191_v2, 2 }
   0xc   : > { %v201_v6 = vmul.u32 (!%p126_p3), 256, %v200_v5  ;;  %s208_s16 = smul.u32 (!%p126_p3), 2654435769, %s207_s15 }
   0xe   : > { %s484_s11 = smov (!%p162_p4, %s412_s11), 1  ;;  %v205_v7 = vadd.s32 %v201_v6, %v193_v3  ;;  %v206_v8 = vadd.s32 %v201_v6, %v194_v4  ;;  %v209_v9 = vstv %s208_s16 }
   0xf   : > { %s371_s17 = sshll.u32 %s484_s11, 3 }
  0x10   : > { %v210_v10 = vxor.u32 %v209_v9, %v205_v7  ;;  %v211_v11 = vxor.u32 %v209_v9, %v206_v8  ;;  %s173_s20 = scalar_lea.vmem %s477_s1, %s371_s17  ;;  %s187_s23 = scalar_lea.vmem %s478_s2, %s371_s17 }
  0x11   : > { %v189_v18 = vld [vmem:[%s173_s20] sm:$0xff] }
  0x12   : > { %v212_v12 = vshrl.u32 %v210_v10, 16  ;;  %v213_v13 = vshrl.u32 %v211_v11, 16  ;;  %v230_v23 = vmul.f32 1.4285715, %v189_v18  ;;  %v238_v31 = vcombine.high %v189_v18, %v189_v18 }
  0x14   : > { %v214_v14 = vxor.u32 %v212_v12, %v210_v10  ;;  %v215_v15 = vxor.u32 %v213_v13, %v211_v11  ;;  %v232_v28 = vcombine.high %v230_v23, %v230_v23 }
  0x16   : > { %v216_v16 = vmul.u32 2146121005, %v214_v14  ;;  %v217_v17 = vmul.u32 2146121005, %v215_v15 }
  0x18   : > { %v218_v19 = vshrl.u32 %v216_v16, 15  ;;  %v219_v20 = vshrl.u32 %v217_v17, 15 }
  0x1a   : > { %v220_v21 = vxor.u32 %v218_v19, %v216_v16  ;;  %v221_v22 = vxor.u32 %v219_v20, %v217_v17 }
  0x1c   : > { %v222_v24 = vmul.u32 2221713035, %v220_v21  ;;  %v223_v25 = vmul.u32 2221713035, %v221_v22 }
  0x1e   : > { %v224_v26 = vshrl.u32 %v222_v24, 16  ;;  %v225_v27 = vshrl.u32 %v223_v25, 16 }
  0x20   : > { %v226_v29 = vxor.u32 %v224_v26, %v222_v24  ;;  %v227_v30 = vxor.u32 %v225_v27, %v223_v25 }
  0x22   : > { %vm228_vm1 = vcmp.ge.u32.totalorder %v226_v29, 1288490189  ;;  %vm229_vm2 = vcmp.ge.u32.totalorder %v227_v30, 1288490189 }
  0x23   : > { %v234_v32 = vsel %vm228_vm1, %v230_v23, 0.0  ;;  %v235_v33 = vsel %vm229_vm2, %v232_v28, 0.0 }
  0x24   : > { %v240_v34 = vsel %vm236_vm0, %v234_v32, %v189_v18  ;;  %v241_v35 = vsel %vm236_vm0, %v235_v33, %v238_v31 }
  0x25   : > { %v244_v36 = vcombine.low %v240_v34, %v241_v35 }
  0x27   : > { %246 = vst [vmem:[%s187_s23] sm:$0xff] %v244_v36 }
  0x28 PF: > { %s13_s13 = sadd.s32 1, %s420_s13   ;;  %s479_s11 = smov %s416_s12 }
  0x29   : > { %p10_p5 = scmp.ge.s32.totalorder %s13_s13, 4   ;;  %s480_s12 = smov %s482_s0 }
  0x2b   :  { %12 = sbr.rel (!%p10_p5) target bundleno = 2 (0x2), region = 54 }

</bundles_post_ra>
